<compile_context>
chip_gen: v7x
topology: tpu7x:2x2x1
jax: 0.10.0
libtpu: 0.0.40
codegen_flags: <defaults>
</compile_context>

<pallas_src>
import jax
import jax.numpy as jnp
from jax.experimental import pallas as pl
from jax.experimental.pallas import tpu as pltpu


def _deepstream_kernel(x_ref, o_ref):
    # x_ref block: (1, tile_n, C) with C = 4 box + 1 obj + nc classes
    # o_ref block: (1, tile_n, 6)
    x = x_ref[...]                                         # single lane-padded load
    cls = x[:, :, 5:]                                      # (1, tn, nc)

    # Class max over the lane axis (XLU cross-lane reduce, hidden under HBM).
    best_val = jnp.max(cls, axis=-1, keepdims=True)        # (1, tn, 1)

    # argmax with first-occurrence tie-breaking (matches torch/jnp argmax).
    # NOTE: a NaN class score makes best_val NaN and best_idx the sentinel
    # (== nc); inference inputs are assumed NaN-free.
    idx = jax.lax.broadcasted_iota(jnp.int32, cls.shape, dimension=2)
    sentinel = jnp.int32(cls.shape[-1])
    best_idx = jnp.min(jnp.where(cls == best_val, idx, sentinel),
                       axis=-1, keepdims=True)             # (1, tn, 1) int32

    # scores *= objectness, in x.dtype (bf16-native on v6e/v7x; f32 otherwise).
    scores = best_val * x[:, :, 4:5]

    o_ref[:, :, 0:4] = x[:, :, 0:4]
    o_ref[:, :, 4:5] = scores.astype(o_ref.dtype)
    # NOTE: labels emitted in x.dtype to match the PyTorch module; bf16 inputs
    # with >256 classes would lose label exactness (use f32 inputs there).
    o_ref[:, :, 5:6] = best_idx.astype(o_ref.dtype)


def _choose_tiling(N, *, min_steps=4, max_tile=2048):
    """Return (padded_N, tile_n).

    tile_n divides padded_N and is a multiple of 8 (sublane axis) unless it
    covers the whole axis.  Large N gets >= min_steps grid steps so the
    BlockSpec pipeline (and v7x's two TensorCores) have work to overlap.
    """
    if N <= max_tile // 2:
        return N, N                     # small: one whole-axis block per batch

    cap = min(max_tile, max(8, N // min_steps))
    cap -= cap % 8
    best = 0
    t = 8
    while t <= cap:                     # largest multiple-of-8 divisor of N
        if N % t == 0:
            best = t
        t += 8
    if best >= 128:
        return N, best                  # good divisor, no padding needed

    # No decent divisor (prime-ish N): pad N up to a multiple of a 128-aligned
    # tile.  Padding costs one extra pass over the input, only on awkward N.
    tile = max(128, cap - cap % 128)
    padded = ((N + tile - 1) // tile) * tile
    return padded, tile


def deepstream_output(x, *, tile_n=None):
    """x: [B, N, C] with C >= 6 (4 box + 1 obj + nc classes). Returns [B, N, 6]."""
    B, N, C = x.shape
    assert C >= 6, "need at least 4 box + 1 obj + 1 class channel"
    nc = C - 5
    itemsize = jnp.dtype(x.dtype).itemsize

    if tile_n is None:
        padded_n, tile_n = _choose_tiling(N)
    else:
        padded_n = ((N + tile_n - 1) // tile_n) * tile_n
    assert tile_n % 8 == 0 or tile_n == padded_n, (
        "tile_n must be a multiple of 8 (sublane axis) unless it covers the "
        "whole N axis")

    if padded_n != N:
        x = jnp.pad(x, ((0, 0), (0, padded_n - N), (0, 0)))

    grid = (B, padded_n // tile_n)

    # VMEM budget: double-buffered input + output blocks (lane-padded to 128)
    # plus a few block-sized in-kernel temporaries (iota / compare / select).
    lanes_in = ((C + 127) // 128) * 128
    block_in = tile_n * lanes_in * itemsize
    block_out = tile_n * 128 * itemsize
    scratch = 4 * tile_n * lanes_in * 4
    vmem_bytes = int(min(48 << 20, max(8 << 20, 2 * block_in + 2 * block_out + scratch)))

    cost = pl.CostEstimate(
        flops=4 * B * padded_n * nc,
        transcendentals=0,
        bytes_accessed=B * padded_n * (C + 6) * itemsize,
    )

    out = pl.pallas_call(
        _deepstream_kernel,
        out_shape=jax.ShapeDtypeStruct((B, padded_n, 6), x.dtype),
        grid_spec=pl.GridSpec(
            grid=grid,
            in_specs=[pl.BlockSpec((1, tile_n, C), lambda b, i: (b, i, 0))],
            out_specs=pl.BlockSpec((1, tile_n, 6), lambda b, i: (b, i, 0)),
        ),
        compiler_params=pltpu.CompilerParams(
            # Both grid axes are independent -> lets v7x megacore shard steps.
            dimension_semantics=("parallel", "parallel"),
            vmem_limit_bytes=vmem_bytes,
        ),
        cost_estimate=cost,
    )(x)

    if padded_n != N:
        out = out[:, :N, :]
    return out


def _reference(x):
    boxes = x[:, :, :4]
    objectness = x[:, :, 4:5]
    cls = x[:, :, 5:]
    scores = jnp.max(cls, axis=-1, keepdims=True) * objectness
    labels = jnp.argmax(cls, axis=-1, keepdims=True).astype(boxes.dtype)
    return jnp.concatenate([boxes, scores, labels], axis=-1)


if __name__ == "__main__":
    key = jax.random.PRNGKey(0)

    # Small shape consistent with the module: [B, N, 4 + 1 + num_classes].
    B, N, num_classes = 2, 16, 8
    C = 4 + 1 + num_classes            # 13 channels
    x = jax.random.uniform(key, (B, N, C), dtype=jnp.float32)

    out = jax.block_until_ready(deepstream_output(x))
    ref = _reference(x)
    assert out.shape == (B, N, 6)
    assert jnp.allclose(out, ref, atol=1e-6), "mismatch vs reference (small)"

    # Tiled multi-step path on the natural layout.
    x2 = jax.random.uniform(jax.random.PRNGKey(1), (2, 256, C), dtype=jnp.float32)
    out2 = jax.block_until_ready(deepstream_output(x2, tile_n=128))
    assert jnp.allclose(out2, _reference(x2), atol=1e-6), "mismatch vs reference (tiled)"

    # N not a multiple of the tile -> exercises the wrapper padding path.
    x3 = jax.random.uniform(jax.random.PRNGKey(2), (1, 200, C), dtype=jnp.float32)
    out3 = jax.block_until_ready(deepstream_output(x3, tile_n=64))
    assert out3.shape == (1, 200, 6)
    assert jnp.allclose(out3, _reference(x3), atol=1e-6), "mismatch vs reference (padded)"

    print("KERNEL_OK")
</pallas_src>

<mosaic_0001>
module attributes {stable_mosaic.version = 11 : i64} {
  func.func @_deepstream_kernel(%arg0: i32, %arg1: i32, %arg2: memref<1x16x13xf32, #tpu.memory_space<vmem>>, %arg3: memref<1x16x6xf32, #tpu.memory_space<vmem>>) attributes {dimension_semantics = [#tpu.dimension_semantics<parallel>, #tpu.dimension_semantics<parallel>], iteration_bounds = array<i64: 2, 1>, scalar_prefetch = 0 : i64, scratch_operands = 0 : i64, tpu.core_type = #tpu.core_type<tc>, window_params = [{transform_indices = @transform_0, window_bounds = array<i64: 1, 16, 13>}, {transform_indices = @transform_1, window_bounds = array<i64: 1, 16, 6>}]} {
    %c0 = arith.constant 0 : index
    %c0_0 = arith.constant 0 : index
    %c0_1 = arith.constant 0 : index
    %0 = vector.load %arg2[%c0, %c0_0, %c0_1] : memref<1x16x13xf32, #tpu.memory_space<vmem>>, vector<1x16x13xf32>
    %1 = vector.extract_strided_slice %0 {offsets = [0, 0, 5], sizes = [1, 16, 8], strides = [1, 1, 1]} : vector<1x16x13xf32> to vector<1x16x8xf32>
    %cst = arith.constant dense<0xFF800000> : vector<1x16xf32>
    %2 = vector.multi_reduction <maximumf>, %1, %cst [2] : vector<1x16x8xf32> to vector<1x16xf32>
    %3 = vector.shape_cast %2 : vector<1x16xf32> to vector<1x16x1xf32>
    %4 = tpu.iota {dimensions = array<i32: 2>} : vector<1x16x8xi32>
    %5 = vector.broadcast %3 : vector<1x16x1xf32> to vector<1x16x8xf32>
    %6 = arith.cmpf oeq, %1, %5 : vector<1x16x8xf32>
    %c8_i32 = arith.constant 8 : i32
    %7 = vector.broadcast %c8_i32 : i32 to vector<1x16x8xi32>
    %8 = arith.select %6, %4, %7 : vector<1x16x8xi1>, vector<1x16x8xi32>
    %cst_2 = arith.constant dense<2147483647> : vector<1x16xi32>
    %9 = vector.multi_reduction <minsi>, %8, %cst_2 [2] : vector<1x16x8xi32> to vector<1x16xi32>
    %10 = vector.shape_cast %9 : vector<1x16xi32> to vector<1x16x1xi32>
    %11 = vector.extract_strided_slice %0 {offsets = [0, 0, 4], sizes = [1, 16, 1], strides = [1, 1, 1]} : vector<1x16x13xf32> to vector<1x16x1xf32>
    %12 = arith.mulf %3, %11 : vector<1x16x1xf32>
    %13 = vector.extract_strided_slice %0 {offsets = [0, 0, 0], sizes = [1, 16, 4], strides = [1, 1, 1]} : vector<1x16x13xf32> to vector<1x16x4xf32>
    %c0_3 = arith.constant 0 : index
    %c0_4 = arith.constant 0 : index
    %c0_5 = arith.constant 0 : index
    %14 = vector.load %arg3[%c0_3, %c0_4, %c0_5] : memref<1x16x6xf32, #tpu.memory_space<vmem>>, vector<1x16x4xf32>
    tpu.vector_store %arg3[%c0_3, %c0_4, %c0_5], %13 {strides = array<i32>} : memref<1x16x6xf32, #tpu.memory_space<vmem>>, vector<1x16x4xf32>,
    %c0_6 = arith.constant 0 : index
    %c0_7 = arith.constant 0 : index
    %c4 = arith.constant 4 : index
    %15 = vector.load %arg3[%c0_6, %c0_7, %c4] : memref<1x16x6xf32, #tpu.memory_space<vmem>>, vector<1x16x1xf32>
    tpu.vector_store %arg3[%c0_6, %c0_7, %c4], %12 {strides = array<i32>} : memref<1x16x6xf32, #tpu.memory_space<vmem>>, vector<1x16x1xf32>,
    %16 = arith.sitofp %10 : vector<1x16x1xi32> to vector<1x16x1xf32>
    %c0_8 = arith.constant 0 : index
    %c0_9 = arith.constant 0 : index
    %c5 = arith.constant 5 : index
    %17 = vector.load %arg3[%c0_8, %c0_9, %c5] : memref<1x16x6xf32, #tpu.memory_space<vmem>>, vector<1x16x1xf32>
    tpu.vector_store %arg3[%c0_8, %c0_9, %c5], %16 {strides = array<i32>} : memref<1x16x6xf32, #tpu.memory_space<vmem>>, vector<1x16x1xf32>,
    return
  }
  func.func @transform_0(%arg0: i32, %arg1: i32) -> (i32, i32, i32) {
    %c0_i32 = arith.constant 0 : i32
    %c0_i32_0 = arith.constant 0 : i32
    return %arg0, %arg1, %c0_i32 : i32, i32, i32
  }
  func.func @transform_1(%arg0: i32, %arg1: i32) -> (i32, i32, i32) {
    %c0_i32 = arith.constant 0 : i32
    %c0_i32_0 = arith.constant 0 : i32
    return %arg0, %arg1, %c0_i32 : i32, i32, i32
  }
}

</mosaic_0001>

<bundles_post_ra>
// kernel: tpu_custom_call.1
= control target key start
LH: loop header
LB: loop body
LE: loop exit
PB: predicated region body
PF: predicated region fallthrough
CT: control target
= control target key end

     0   :  { %s376_s6 = smov 0   ;;  %s378_s7 = smov 0   ;;  %s421_s0 = inlined_call_operand.vmem [shape: f32[2,16,13], index: 0, kind: input, shape index: {}]   ;;  %s422_s1 = inlined_call_operand.vmem [shape: f32[2,16,6], index: 1, kind: output, shape index: {}]  }
   0x1   :  { %s380_s8 = smov 0  }
   0x2 LB: > { %s23_s9 = sadd.s32 1, %s359_s7  ;;  %p307_p0 = scmp.ge.s32.totalorder %s363_s8, 1  ;;  %s363_s8 = sphi %s380_s8, %s11_s8   ;;  %s359_s7 = sphi %s378_s7, %s424_s7   ;;  %s355_s6 = sphi %s376_s6, %s423_s6  }
   0x3   : > { %p25_p1 = scmp.ge.s32.totalorder %s23_s9, 2  ;;  %p108_p2 = scmp.lt.s32.totalorder %s363_s8, 3 }
   0x5   : > { %s426_s9 = smov (%p25_p1, %s23_s9), 0  ;;  %p109_p3 = pnand %p307_p0, %p108_p2 }
   0x6   : > { %p137_p4 = scmp.lt.s32.totalorder (!%p109_p3), %s355_s6, 1  ;;  %v165_v0 = vlaneseq (!%p109_p3)  ;;  %vm158_vm0 = vcmask (!%p109_p3), 105512   ;;  %vm205_vm1 = vcmask (!%p109_p3), 31744   ;;  %s365_s11 = smov (!%p109_p3), 5   ;;  %vm208_vm2 = vcmask (!%p109_p3), 39968  }
   0x7   : > { %112 = sbr.rel (%p109_p3) target bundleno = 465 (0x1d1), region = 24  ;;  %vm213_vm7 = vcmask (!%p109_p3), 48168  }
   0x8   : > { %v166_v1 = vand.u32 (!%p109_p3), 127, %v165_v0 }
   0xa   : > { %169 = vrot.lane.b32.xlu1 (!%p109_p3), %v166_v1, %s365_s11 }
   0xe   : > { %s428_s6 = smov (!%p137_p4, %s355_s6), 1 }
   0xf   : > { %s314_s10 = sshll.u32 %s428_s6, 4 }
  0x10   : > { %s144_s14 = scalar_lea.vmem %s421_s0, %s314_s10  ;;  %s400_s17 = scalar_lea.vmem %s422_s1, %s314_s10 }
  0x11   : > { %v156_v2 = vld [vmem:[%s144_s14] sm:$0xff]  ;;  %v157_v3 = vld [vmem:[%s144_s14 + $0x8] sm:$0xff] }
  0x12   : > { %v159_v4 = vsel %vm158_vm0, %v156_v2, -inf  ;;  %206 = vst.msk [vmem:[%s400_s17] sm:$0xff] %vm205_vm1, %v156_v2  ;;  %207 = vst.msk [vmem:[%s400_s17 + $0x8] sm:$0xff] %vm205_vm1, %v157_v3  ;;  %v162_v5 = vsel %vm158_vm0, %v157_v3, -inf }
  0x13   : > { %160 = vmax.xlane.f32.xlu0 %v159_v4 }
  0x17   : > { %163 = vmax.xlane.f32.xlu0 %v162_v5 }
  0x7c   : > { %v170_v6 = vpop.permute.xlu1 %169 }
  0xa0   : > { %v161_v7 = vpop.xlane.xlu0 %160 }
  0xa1   : > { %vm167_vm3 = vcmp.eq.f32.partialorder %v156_v2, %v161_v7  ;;  %v203_v8 = vmul.f32 %v161_v7, %v156_v2 }
  0xa2   : > { %v171_v9 = vsel %vm167_vm3, %v170_v6, 8 }
  0xa3   : > { %209 = vst.msk [vmem:[%s400_s17] sm:$0xff] %vm208_vm2, %v203_v8  ;;  %v173_v10 = vsel %vm158_vm0, %v171_v9, 2147483647 }
  0xa4   : > { %v164_v11 = vpop.xlane.xlu0 %163  ;;  %v175_v12 = vshra.s32 %v173_v10, 16  ;;  %v174_v19 = vand.u32 65535, %v173_v10 }
  0xa5   : > { %vm168_vm4 = vcmp.eq.f32.partialorder %v157_v3, %v164_v11  ;;  %v204_v13 = vmul.f32 %v164_v11, %v157_v3 }
  0xa6   : > { %v172_v14 = vsel %vm168_vm4, %v170_v6, 8  ;;  %v177_v15 = vcvt.s32.f32 %v175_v12  ;;  %v176_v21 = vcvt.s32.f32 %v174_v19 }
  0xa7   : > { %210 = vst.msk [vmem:[%s400_s17 + $0x8] sm:$0xff] %vm208_vm2, %v204_v13  ;;  %v188_v16 = vsel %vm158_vm0, %v172_v14, 2147483647 }
  0xa8   : > { %178 = vmin.xlane.f32.xlu1 %v177_v15  ;;  %v190_v17 = vshra.s32 %v188_v16, 16  ;;  %v189_v22 = vand.u32 65535, %v188_v16 }
  0xaa   : > { %v192_v18 = vcvt.s32.f32 %v190_v17  ;;  %v191_v25 = vcvt.s32.f32 %v189_v22 }
  0xac   : > { %193 = vmin.xlane.f32.xlu0 %v192_v18 }
 0x135   : > { %v179_v20 = vpop.xlane.xlu1 %178 }
 0x136   : > { %vm180_vm5 = vcmp.eq.f32.partialorder %v177_v15, %v179_v20  ;;  %v185_v27 = vcvt.f32.s32 %v179_v20 }
 0x137   : > { %v181_v23 = vsel %vm180_vm5, %v176_v21, inf }
 0x138   : > { %182 = vmin.xlane.f32.xlu0 %v181_v23  ;;  %v186_v29 = vshll.u32 %v185_v27, 16 }
 0x139   : > { %v194_v24 = vpop.xlane.xlu0 %193 }
 0x13a   : > { %vm195_vm6 = vcmp.eq.f32.partialorder %v192_v18, %v194_v24  ;;  %v200_v30 = vcvt.f32.s32 %v194_v24 }
 0x13b   : > { %v196_v26 = vsel %vm195_vm6, %v191_v25, inf }
 0x13c   : > { %197 = vmin.xlane.f32.xlu0 %v196_v26  ;;  %v201_v34 = vshll.u32 %v200_v30, 16 }
 0x1c5   : > { %v183_v28 = vpop.xlane.xlu0 %182 }
 0x1c6   : > { %v184_v31 = vcvt.f32.s32 %v183_v28 }
 0x1c8   : > { %v187_v32 = vadd.s32 %v186_v29, %v184_v31 }
 0x1c9   : > { %v198_v33 = vpop.xlane.xlu0 %197 }
 0x1ca   : > { %v211_v35 = vcvt.s32.f32 %v187_v32  ;;  %v199_v36 = vcvt.f32.s32 %v198_v33 }
 0x1cc   : > { %214 = vst.msk [vmem:[%s400_s17] sm:$0xff] %vm213_vm7, %v211_v35  ;;  %v202_v37 = vadd.s32 %v201_v34, %v199_v36 }
 0x1ce   : > { %v212_v38 = vcvt.s32.f32 %v202_v37 }
 0x1d0   : > { %215 = vst.msk [vmem:[%s400_s17 + $0x8] sm:$0xff] %vm213_vm7, %v212_v38 }
 0x1d1 PF: > { %s11_s8 = sadd.s32 1, %s363_s8   ;;  %s423_s6 = smov %s359_s7 }
 0x1d2   : > { %p8_p5 = scmp.ge.s32.totalorder %s11_s8, 4   ;;  %s424_s7 = smov %s426_s9 }
 0x1d4   :  { %10 = sbr.rel (!%p8_p5) target bundleno = 2 (0x2), region = 54 }

</bundles_post_ra>
